<compile_context>
chip_gen: v7x
topology: tpu7x:2x2x1
jax: 0.10.0
libtpu: 0.0.40
codegen_flags: <defaults>
</compile_context>

<pallas_src>
import jax
import jax.numpy as jnp
from jax import lax
from jax.experimental import pallas as pl
from jax.experimental.pallas import tpu as pltpu


def _make_kernel(TB, TS, TH, tail_len):
    """Builds the kernel for static tile sizes (TB, TS, TH)."""
    has_tail = tail_len != TS  # last S block extends past S

    def masked_partial(x, m):
        """x: (TB, TS, TH), m: (TB, TS) in x.dtype ->
           ((TB, TH) f32 masked sum over s, (TB, 1) f32 token count)."""
        cnt = jnp.sum(m.astype(jnp.float32), axis=1, keepdims=True)
        if TB == 1:
            ssum = jnp.dot(m, x.reshape(TS, TH),
                           preferred_element_type=jnp.float32)
        else:
            # One real (TB x TB*TS) @ (TB*TS x TH) matmul per step: the LHS is
            # the mask laid out block-diagonally so batch rows never mix.
            x2 = x.reshape(TB * TS, TH)                      # free leading merge
            row = lax.broadcasted_iota(jnp.int32, (TB, TB * TS), 0)
            col = lax.broadcasted_iota(jnp.int32, (TB, TB * TS), 1)
            lo = row * TS
            band = (col >= lo) & (col < lo + TS)             # col // TS == row
            m_rep = jnp.tile(m, (1, TB))                     # (TB, TB*TS)
            lhs = jnp.where(band, m_rep, jnp.zeros_like(m_rep))
            ssum = jnp.dot(lhs, x2, preferred_element_type=jnp.float32)
        return ssum, cnt

    def kernel(x_ref, m_ref, o_ref, cnt_ref):
        s = pl.program_id(2)
        n_s = pl.num_programs(2)

        @pl.when(s == 0)
        def _init():
            o_ref[...] = jnp.zeros_like(o_ref)       # f32 accumulator = output
            cnt_ref[...] = jnp.zeros_like(cnt_ref)

        def accumulate(x, m):
            ssum, cnt = masked_partial(x, m)
            o_ref[...] += ssum
            cnt_ref[...] += cnt

        if has_tail:
            @pl.when(s < n_s - 1)
            def _full_block():
                accumulate(x_ref[...], m_ref[...])

            @pl.when(s == n_s - 1)
            def _tail_block():
                # Positions >= tail_len in this block are out of bounds in HBM
                # (undefined contents).  Select them away in both the mask
                # (denominator) and x (numerator); a multiply-by-zero would let
                # NaN/Inf garbage through (0 * NaN = NaN).
                pos = lax.broadcasted_iota(jnp.int32, (TB, TS), 1)
                valid = pos < tail_len
                m = jnp.where(valid, m_ref[...],
                              jnp.zeros((TB, TS), m_ref.dtype))
                x = jnp.where(jnp.broadcast_to(valid[:, :, None], (TB, TS, TH)),
                              x_ref[...],
                              jnp.zeros((TB, TS, TH), x_ref.dtype))
                accumulate(x, m)
        else:
            accumulate(x_ref[...], m_ref[...])

        @pl.when(s == n_s - 1)
        def _finalize():
            cnt = jnp.maximum(cnt_ref[...], 1e-9)     # torch.clamp(min=1e-9)
            inv = pl.reciprocal(cnt, approx=True)     # EUP slot
            inv = inv * (2.0 - cnt * inv)             # one Newton step
            o_ref[...] = o_ref[...] * inv

    return kernel


def mean_pooling(last_hidden_state, attention_mask, *,
                 target_block_bytes=8 * 1024 * 1024,
                 vmem_limit_bytes=48 * 1024 * 1024):
    """Masked mean pooling over the sequence axis.

    Args:
      last_hidden_state: [B, S, H] float array.
      attention_mask:    [B, S] numeric array (0/1).
    Returns:
      [B, H] float32 mean embeddings.
    """
    B, S, H = last_hidden_state.shape
    assert attention_mask.shape == (B, S), (attention_mask.shape, (B, S))

    x = last_hidden_state
    if not jnp.issubdtype(x.dtype, jnp.floating):
        x = x.astype(jnp.float32)
    m = attention_mask.astype(x.dtype)       # 0/1 is exact in bf16/f16/f32
    itemsize = jnp.dtype(x.dtype).itemsize

    # --- batch tile: 8 rows when available (full (8,128) output tiles). -----
    TB = 8 if B >= 8 else B
    nB = pl.cdiv(B, TB)

    # --- hidden tile: keep a minimum-height (TS=128) block within budget, ---
    # --- and guarantee >=2 parallel blocks when there is one batch block. ---
    TH = H
    if H > 128 and H % 128 == 0:
        th_budget = target_block_bytes // (TB * min(S, 128) * itemsize)
        th_budget = max(128, (th_budget // 128) * 128)
        TH = min(H, th_budget)
        if nB == 1 and TH == H:
            TH = max(128, ((H // 2) // 128) * 128)   # feed both v7x TensorCores
    nH = pl.cdiv(H, TH)

    # --- sequence tile: ~target_block_bytes per x block, multiple of 128. ---
    row_bytes = TB * TH * itemsize
    if S * row_bytes <= target_block_bytes:
        TS = S                                        # one block, no tail
    else:
        ts_cap = max(128, (target_block_bytes // row_bytes) // 128 * 128)
        TS = 0
        t = ts_cap
        while t >= max(128, ts_cap // 2):             # prefer a divisor of S
            if S % t == 0:
                TS = t
                break
            t -= 128
        if TS == 0:
            TS = ts_cap                               # tail handled in-kernel
    nS = pl.cdiv(S, TS)
    tail_len = S - (nS - 1) * TS

    kernel = _make_kernel(TB, TS, TH, tail_len)

    out = pl.pallas_call(
        kernel,
        out_shape=jax.ShapeDtypeStruct((B, H), jnp.float32),
        grid_spec=pltpu.PrefetchScalarGridSpec(
            num_scalar_prefetch=0,
            grid=(nB, nH, nS),
            in_specs=[
                pl.BlockSpec((TB, TS, TH), lambda b, h, s: (b, s, h)),
                pl.BlockSpec((TB, TS), lambda b, h, s: (b, s)),
            ],
            out_specs=pl.BlockSpec((TB, TH), lambda b, h, s: (b, h)),
            scratch_shapes=[
                pltpu.VMEM((TB, 1), jnp.float32),     # token-count accumulator
            ],
        ),
        compiler_params=pltpu.CompilerParams(
            dimension_semantics=("parallel", "parallel", "arbitrary"),
            vmem_limit_bytes=vmem_limit_bytes,
        ),
    )(x, m)
    return out


if __name__ == "__main__":
    key = jax.random.PRNGKey(0)
    k_x, k_m = jax.random.split(key)

    B, S, H = 2, 8, 32
    last_hidden_state = jax.random.normal(k_x, (B, S, H), dtype=jnp.float32)
    # 0/1 attention mask (ensure at least one attended token per row).
    attention_mask = (jax.random.uniform(k_m, (B, S)) > 0.3).astype(jnp.int32)
    attention_mask = attention_mask.at[:, 0].set(1)

    out = mean_pooling(last_hidden_state, attention_mask)
    out = jax.block_until_ready(out)

    # Pure-JAX reference (same math as the PyTorch module).
    mf = attention_mask.astype(jnp.float32)[:, :, None]
    ref = jnp.sum(last_hidden_state * mf, axis=1) / jnp.maximum(
        jnp.sum(mf, axis=1), 1e-9
    )
    assert out.shape == (B, H)
    assert jnp.allclose(out, ref, atol=1e-5, rtol=1e-5), float(
        jnp.max(jnp.abs(out - ref))
    )

    print("KERNEL_OK")
</pallas_src>

<mosaic_0001>
module attributes {stable_mosaic.version = 11 : i64} {
  func.func @kernel(%arg0: i32, %arg1: i32, %arg2: i32, %arg3: memref<2x8x32xf32, #tpu.memory_space<vmem>>, %arg4: memref<2x8xf32, #tpu.memory_space<vmem>>, %arg5: memref<2x32xf32, #tpu.memory_space<vmem>>, %arg6: memref<2x1xf32, #tpu.memory_space<vmem>>) attributes {dimension_semantics = [#tpu.dimension_semantics<parallel>, #tpu.dimension_semantics<parallel>, #tpu.dimension_semantics<arbitrary>], iteration_bounds = array<i64: 1, 1, 1>, scalar_prefetch = 0 : i64, scratch_operands = 1 : i64, tpu.core_type = #tpu.core_type<tc>, window_params = [{transform_indices = @transform_0, window_bounds = array<i64: 2, 8, 32>}, {transform_indices = @transform_1, window_bounds = array<i64: 2, 8>}, {transform_indices = @transform_2, window_bounds = array<i64: 2, 32>}]} {
    %c0_i32 = arith.constant 0 : i32
    %0 = arith.cmpi eq, %arg2, %c0_i32 : i32
    %1 = arith.extui %0 : i1 to i32
    %c0_i32_0 = arith.constant 0 : i32
    %2 = arith.cmpi ne, %1, %c0_i32_0 : i32
    scf.if %2 {
      %cst_18 = arith.constant 0.000000e+00 : f32
      %30 = vector.broadcast %cst_18 : f32 to vector<2x32xf32>
      %c0_19 = arith.constant 0 : index
      %c0_20 = arith.constant 0 : index
      %31 = vector.load %arg5[%c0_19, %c0_20] : memref<2x32xf32, #tpu.memory_space<vmem>>, vector<2x32xf32>
      tpu.vector_store %arg5[%c0_19, %c0_20], %30 {strides = array<i32>} : memref<2x32xf32, #tpu.memory_space<vmem>>, vector<2x32xf32>,
      %cst_21 = arith.constant 0.000000e+00 : f32
      %32 = vector.broadcast %cst_21 : f32 to vector<2x1xf32>
      %c0_22 = arith.constant 0 : index
      %c0_23 = arith.constant 0 : index
      %33 = vector.load %arg6[%c0_22, %c0_23] : memref<2x1xf32, #tpu.memory_space<vmem>>, vector<2x1xf32>
      tpu.vector_store %arg6[%c0_22, %c0_23], %32 {strides = array<i32>} : memref<2x1xf32, #tpu.memory_space<vmem>>, vector<2x1xf32>,
    } else {
    }
    %c0 = arith.constant 0 : index
    %c0_1 = arith.constant 0 : index
    %c0_2 = arith.constant 0 : index
    %3 = vector.load %arg3[%c0, %c0_1, %c0_2] : memref<2x8x32xf32, #tpu.memory_space<vmem>>, vector<2x8x32xf32>
    %c0_3 = arith.constant 0 : index
    %c0_4 = arith.constant 0 : index
    %4 = vector.load %arg4[%c0_3, %c0_4] : memref<2x8xf32, #tpu.memory_space<vmem>>, vector<2x8xf32>
    %cst = arith.constant dense<0.000000e+00> : vector<2xf32>
    %5 = vector.multi_reduction <add>, %4, %cst [1] : vector<2x8xf32> to vector<2xf32>
    %6 = vector.shape_cast %5 : vector<2xf32> to vector<2x1xf32>
    %7 = vector.shape_cast %3 : vector<2x8x32xf32> to vector<16x32xf32>
    %8 = tpu.iota {dimensions = array<i32: 0>} : vector<2x16xi32>
    %9 = tpu.iota {dimensions = array<i32: 1>} : vector<2x16xi32>
    %c8_i32 = arith.constant 8 : i32
    %10 = vector.broadcast %c8_i32 : i32 to vector<2x16xi32>
    %11 = arith.muli %8, %10 : vector<2x16xi32>
    %12 = arith.cmpi sge, %9, %11 : vector<2x16xi32>
    %c8_i32_5 = arith.constant 8 : i32
    %13 = vector.broadcast %c8_i32_5 : i32 to vector<2x16xi32>
    %14 = arith.addi %11, %13 : vector<2x16xi32>
    %15 = arith.cmpi slt, %9, %14 : vector<2x16xi32>
    %16 = arith.andi %12, %15 : vector<2x16xi1>
    %17 = tpu.concatenate %4, %4 in 1 : vector<2x8xf32>, vector<2x8xf32> -> vector<2x16xf32>
    %cst_6 = arith.constant 0.000000e+00 : f32
    %18 = vector.broadcast %cst_6 : f32 to vector<2x16xf32>
    %19 = arith.select %16, %17, %18 : vector<2x16xi1>, vector<2x16xf32>
    %cst_7 = arith.constant dense<0.000000e+00> : vector<2x32xf32>
    %20 = tpu.matmul %19, %7, %cst_7 {dimension_numbers = #tpu.dot_dimension_numbers<[1], [0], [0], [1], [0, 0, 1, 1], [], []>} : vector<2x16xf32>, vector<16x32xf32>, vector<2x32xf32> -> vector<2x32xf32>
    %c0_8 = arith.constant 0 : index
    %c0_9 = arith.constant 0 : index
    %21 = vector.load %arg5[%c0_8, %c0_9] : memref<2x32xf32, #tpu.memory_space<vmem>>, vector<2x32xf32>
    %22 = arith.addf %21, %20 : vector<2x32xf32>
    %c0_10 = arith.constant 0 : index
    %c0_11 = arith.constant 0 : index
    %23 = vector.load %arg5[%c0_10, %c0_11] : memref<2x32xf32, #tpu.memory_space<vmem>>, vector<2x32xf32>
    tpu.vector_store %arg5[%c0_10, %c0_11], %22 {strides = array<i32>} : memref<2x32xf32, #tpu.memory_space<vmem>>, vector<2x32xf32>,
    %c0_12 = arith.constant 0 : index
    %c0_13 = arith.constant 0 : index
    %24 = vector.load %arg6[%c0_12, %c0_13] : memref<2x1xf32, #tpu.memory_space<vmem>>, vector<2x1xf32>
    %25 = arith.addf %24, %6 : vector<2x1xf32>
    %c0_14 = arith.constant 0 : index
    %c0_15 = arith.constant 0 : index
    %26 = vector.load %arg6[%c0_14, %c0_15] : memref<2x1xf32, #tpu.memory_space<vmem>>, vector<2x1xf32>
    tpu.vector_store %arg6[%c0_14, %c0_15], %25 {strides = array<i32>} : memref<2x1xf32, #tpu.memory_space<vmem>>, vector<2x1xf32>,
    %c0_i32_16 = arith.constant 0 : i32
    %27 = arith.cmpi eq, %arg2, %c0_i32_16 : i32
    %28 = arith.extui %27 : i1 to i32
    %c0_i32_17 = arith.constant 0 : i32
    %29 = arith.cmpi ne, %28, %c0_i32_17 : i32
    scf.if %29 {
      %c0_18 = arith.constant 0 : index
      %c0_19 = arith.constant 0 : index
      %30 = vector.load %arg6[%c0_18, %c0_19] : memref<2x1xf32, #tpu.memory_space<vmem>>, vector<2x1xf32>
      %cst_20 = arith.constant 9.99999971E-10 : f32
      %31 = vector.broadcast %cst_20 : f32 to vector<2x1xf32>
      %32 = arith.maximumf %30, %31 : vector<2x1xf32>
      %33 = tpu.reciprocal %32 {approx = true} : vector<2x1xf32> -> vector<2x1xf32>
      %34 = arith.mulf %32, %33 : vector<2x1xf32>
      %cst_21 = arith.constant 2.000000e+00 : f32
      %35 = vector.broadcast %cst_21 : f32 to vector<2x1xf32>
      %36 = arith.subf %35, %34 : vector<2x1xf32>
      %37 = arith.mulf %33, %36 : vector<2x1xf32>
      %c0_22 = arith.constant 0 : index
      %c0_23 = arith.constant 0 : index
      %38 = vector.load %arg5[%c0_22, %c0_23] : memref<2x32xf32, #tpu.memory_space<vmem>>, vector<2x32xf32>
      %39 = vector.broadcast %37 : vector<2x1xf32> to vector<2x32xf32>
      %40 = arith.mulf %38, %39 : vector<2x32xf32>
      %c0_24 = arith.constant 0 : index
      %c0_25 = arith.constant 0 : index
      %41 = vector.load %arg5[%c0_24, %c0_25] : memref<2x32xf32, #tpu.memory_space<vmem>>, vector<2x32xf32>
      tpu.vector_store %arg5[%c0_24, %c0_25], %40 {strides = array<i32>} : memref<2x32xf32, #tpu.memory_space<vmem>>, vector<2x32xf32>,
    } else {
    }
    return
  }
  func.func @transform_0(%arg0: i32, %arg1: i32, %arg2: i32) -> (i32, i32, i32) {
    %c0_i32 = arith.constant 0 : i32
    return %arg0, %arg2, %arg1 : i32, i32, i32
  }
  func.func @transform_1(%arg0: i32, %arg1: i32, %arg2: i32) -> (i32, i32) {
    %c0_i32 = arith.constant 0 : i32
    return %arg0, %arg2 : i32, i32
  }
  func.func @transform_2(%arg0: i32, %arg1: i32, %arg2: i32) -> (i32, i32) {
    %c0_i32 = arith.constant 0 : i32
    return %arg0, %arg1 : i32, i32
  }
}

</mosaic_0001>

<bundles_post_ra>
// kernel: tpu_custom_call.1
= control target key start
LH: loop header
LB: loop body
LE: loop exit
PB: predicated region body
PF: predicated region fallthrough
CT: control target
= control target key end

     0   :  { %7 = vsyncpa [#allocation4], 0  ;;  %s300_s0 = inlined_call_operand.hbm [shape: f32[2,8,32], index: 0, kind: input, shape index: {}]   ;;  %s301_s1 = inlined_call_operand.vmem [shape: f32[2,8], index: 1, kind: input, shape index: {}]   ;;  %s302_s2 = inlined_call_operand.hbm [shape: f32[2,32], index: 2, kind: output, shape index: {}]  }
   0x1   :  { %8 = vsyncpa [#allocation5], 0  ;;  %s245_s9 = smov [#allocation3]   ;;  %s197_s13 = scalar_lea.hbm %s300_s0, 256 }
   0x2   :  { %s14_s10 = sshll.u32 %s245_s9, 4  ;;  %p198_p0 = scmp.ne.s32.totalorder %s300_s0, %s197_s13  ;;  %s15_s10 = int_to_ptr.vmem [resolvable:$true] %s14_s10 }
   0x3   :  { %p201_p1 = scmp.lt.u32.totalorder %s197_s13, %s300_s0 }
   0x5   :  { %p203_p2 = pnand %p201_p1, %p198_p0 }
   0x7   :  { %206 = shalt.err (!%p203_p2)
}
   0x8   :  { %s207_s18 = scalar_lea.vmem %s15_s10, 256  ;;  %p212_p4 = scmp.lt.s32.totalorder %s15_s10, %s15_s10 }
   0x9   :  { %p208_p3 = scmp.ne.s32.totalorder %s15_s10, %s207_s18  ;;  %p213_p5 = scmp.lt.s32.totalorder %s207_s18, %s207_s18 }
   0xb   :  { %p214_p6 = por %p213_p5, %p212_p4 }
   0xd   :  { %p215_p7 = pnand %p214_p6, %p208_p3 }
   0xf   :  { %218 = shalt.err (!%p215_p7)
}
  0x10   :  { %s246_s19 = smov 128   ;;  %s247_s20 = smov 8  }
  0x11   :  { %20 = dma.hbm_to_vmem [thread:$0]  %s300_s0, 256, %s15_s10, [#allocation4], %s246_s19, %s246_s19, %s247_s20  }
  0x12   :  { %241 = dma.done.wait [#allocation4], 256  }
  0x13   :  { %242 = vsyncadd [#allocation4], 4294967040  ;;  %v248_v0 = vmov 0.0|0.0   ;;  %vm30_vm0 = vcmask 254976   ;;  %vm32_vm1 = vcmask 1024   ;;  %v249_v1 = vmov 0.0  }
  0x14   :  { %182 = vmatprep.subr.bf16.mxu0 %v248_v0  ;;  %31 = vst.msk [vmem:[#allocation6] sm:$0x3] %vm30_vm0, %v249_v1  ;;  %vm250_vm2 = vmmov 0   ;;  %v36_v2 = vld [vmem:[%s301_s1] sm:$0x3]  ;;  %v34_v3 = vld [vmem:[#allocation3] sm:$0xff]  ;;  %v41_v8 = vlaneseq }
  0x15   :  { %33 = vst.msk [vmem:[#allocation2] sm:$0x3] %vm32_vm1, %v249_v1  ;;  %179 = vmatprep.mubr.msk.f32.mxu0 %vm250_vm2, %v249_v1  ;;  %v35_v4 = vld [vmem:[#allocation3 + $0x8] sm:$0xff]  ;;  %51 = vrot.lane.b32.xlu0 %v36_v2, %s247_s20  ;;  %vm37_vm3 = vcmask 58368   ;;  %v251_v7 = vmov 0   ;;  %vm54_vm6 = vcmask 64512  }
  0x16   :  { %v183_v5 = vpack.c.bf16 %v35_v4, %v34_v3  ;;  %v38_v6 = vsel %vm37_vm3, %v36_v2, 0.0  ;;  %193 = vset.pattern.permute.xlu1 %v251_v7  ;;  %194 = vset.pattern.permute.xlu0 %v251_v7  ;;  %v42_v9 = vshrl.u32 %v41_v8, 7  ;;  %v44_v11 = vand.u32 127, %v41_v8  ;;  %s252_s0 = smov [#allocation6]  }
  0x17   :  { %vm57_vm8 = vcmask 130048   ;;  %s162_s1 = sshll.u32 %s252_s0, 4  ;;  %s163_s1 = int_to_ptr.vmem [resolvable:$true] %s162_s1 }
  0x18   :  { %184 = vmatpush3.bf16.msra.mxu0 %v183_v5  ;;  %v45_v10 = vmul.u32 8, %v42_v9  ;;  %s219_s25 = scalar_lea.vmem %s163_s1, 32  ;;  %p224_p9 = scmp.lt.s32.totalorder %s163_s1, %s163_s1 }
  0x19   :  { %p220_p8 = scmp.ne.s32.totalorder %s163_s1, %s219_s25  ;;  %p225_p10 = scmp.lt.s32.totalorder %s219_s25, %s219_s25 }
  0x1a   :  { %v47_v12 = vadd.s32 8, %v45_v10  ;;  %vm46_vm4 = vcmp.ge.s32.totalorder %v44_v11, %v45_v10 }
  0x1b   :  { %v131_v25 = vld [vmem:[#allocation6] sm:$0x3]  ;;  %p226_p11 = por %p225_p10, %p224_p9 }
  0x1c   :  { %vm48_vm5 = vcmp.lt.s32.totalorder %v44_v11, %v47_v12  ;;  %v135_v16 = vld [vmem:[#allocation2] sm:$0x3] }
  0x1d   :  { %vm49_vm7 = vmand %vm46_vm4, %vm48_vm5  ;;  %p227_p12 = pnand %p226_p11, %p220_p8 }
  0x34   :  { %39 = vadd.xlane.f32.xlu0 %v38_v6 }
  0x87   :  { %v52_v13 = vpop.permute.xlu0 %51 }
  0x88   :  { %v55_v14 = vsel %vm54_vm6, %v36_v2, %v52_v13 }
  0x89   :  { %v56_v15 = vsel %vm49_vm7, %v55_v14, 0.0 }
  0x8a   :  { %180 = vmatmul.mubr.msk.f32.vlgmr.msra.gmra.mrb[0].mxu0 %vm57_vm8, %v56_v15 }
  0xc1   :  { %v40_v17 = vpop.xlane.xlu0 %39 }
  0xc2   :  { %v136_v18 = vadd.f32 %v135_v16, %v40_v17 }
  0xc4   :  { %138 = vst.msk [vmem:[#allocation2] sm:$0x3] %vm32_vm1, %v136_v18 }
  0xcb   :  { %v142_v19 = vld [vmem:[#allocation2] sm:$0x3] }
  0xcc   :  { %v143_v20 = vmax.f32 %v142_v19, 1e-09 }
  0xce   :  { %195 = vrcp.f32 %v143_v20 }
  0xd8   :  { %v196_v21 = vpop.eup %195 }
  0xd9   :  { %v145_v22 = vmul.f32 %v196_v21, %v143_v20 }
  0xdb   :  { %v146_v23 = vsub.f32 2.0, %v145_v22 }
  0xdd   :  { %v147_v24 = vmul.f32 %v196_v21, %v146_v23 }
  0xdf   :  { %151 = vperm.xlu1 %193, %v147_v24  }
 0x15d   :  { %v127_v26 = vpop.f32.mrb[0].mxu0 }
 0x15e   :  { %v132_v27 = vadd.f32 %v131_v25, %v127_v26  ;;  %v181_v28 = vpop.f32.mrb[1].mxu0  ;;  %v152_v29 = vpop.permute.xlu1 %151 }
 0x160   :  { %134 = vst.msk [vmem:[#allocation6] sm:$0x3] %vm30_vm0, %v132_v27 }
 0x167   :  { %v148_v30 = vld [vmem:[#allocation6] sm:$0x3] }
 0x168   :  { %v154_v31 = vmul.f32 %v152_v29, %v148_v30 }
 0x16a   :  { %155 = vst.msk [vmem:[#allocation6] sm:$0x3] %vm30_vm0, %v154_v31 }
 0x16b   :  { %230 = shalt.err (!%p227_p12)
}
 0x16c   :  { %s231_s28 = scalar_lea.hbm %s302_s2, 32 }
 0x16d   :  { %p232_p13 = scmp.ne.s32.totalorder %s302_s2, %s231_s28  ;;  %p235_p0 = scmp.lt.u32.totalorder %s231_s28, %s302_s2 }
 0x16f   :  { %p237_p1 = pnand %p235_p0, %p232_p13 }
 0x171   :  { %240 = shalt.err (!%p237_p1)
}
 0x172   :  { %165 = dma.vmem_to_hbm [thread:$0]  %s163_s1, 32, %s302_s2, [#allocation5]  }
 0x173   :  { %243 = dma.done.wait [#allocation5], 32  }
 0x174   :  { %244 = vsyncadd [#allocation5], 4294967264 }
 0x175   :  { %169 = vsyncpa [#allocation4], 1 }
 0x176   :  { %170 = vsyncpa [#allocation5], 1 }

</bundles_post_ra>
